<compile_context>
chip_gen: v7x
topology: tpu7x:2x2x1
jax: 0.10.0
libtpu: 0.0.40
codegen_flags: <defaults>
</compile_context>

<pallas_src>
import numpy as np

import jax
import jax.numpy as jnp
from jax.experimental import pallas as pl
from jax.experimental.pallas import tpu as pltpu


def _round_up(x, m):
    return ((x + m - 1) // m) * m


def _probe_kernel(x_ref, wsub_ref, bsub_ref, wcomb_ref, bcomb_ref, out_ref):
    # x_ref: (TM, in_dim_p) tile of flattened features; weights are resident.
    x = x_ref[...]

    # stage 1: sub_linear -> (TM, 2S_p), f32 accumulation on the MXU.
    sub = jnp.dot(x, wsub_ref[...], preferred_element_type=jnp.float32)
    sub = sub + bsub_ref[...]

    # stage 2: both heads as a single block-diagonal matmul. Box head reads the
    # first S ("spatial") columns of sub, cls head the next S ("semantic")
    # columns; all other weight entries are exact zeros, so results equal the
    # two separate head matmuls. Output slab is lane-dense (width = 128k).
    out = jnp.dot(sub, wcomb_ref[...].astype(jnp.float32),
                  preferred_element_type=jnp.float32)
    out_ref[...] = (out + bcomb_ref[...]).astype(out_ref.dtype)


@jax.jit
def feature_split_probe(features, params):
    """features: [..., in_dim] -> {'pred_box': [..., box_out], 'pred_cls': [..., cls_out]}"""
    w_sub, b_sub = params["w_sub"], params["b_sub"]
    w_box, b_box = params["w_box"], params["b_box"]
    w_cls, b_cls = params["w_cls"], params["b_cls"]

    in_dim = features.shape[-1]
    lead_shape = features.shape[:-1]
    two_s = w_sub.shape[0]
    s = w_box.shape[1]            # subfeature_dim
    box_out = w_box.shape[0]
    cls_out = w_cls.shape[0]
    out_w = box_out + cls_out

    # lane-aligned padded dims (multiples of 128)
    in_dim_p = _round_up(in_dim, 128)
    two_s_p = _round_up(two_s, 128)
    out_p = _round_up(out_w, 128)

    dtype = features.dtype

    # stage-1 weight pre-transposed to [K, N] and zero-padded (one-time XLA work)
    wsub_t = jnp.zeros((in_dim_p, two_s_p), dtype)
    wsub_t = wsub_t.at[:in_dim, :two_s].set(w_sub.T.astype(dtype))
    bsub_p = jnp.zeros((1, two_s_p), jnp.float32)
    bsub_p = bsub_p.at[0, :two_s].set(b_sub.astype(jnp.float32))

    # block-diagonal fused head weight: (2S_p, out_p)
    wcomb = jnp.zeros((two_s_p, out_p), w_box.dtype)
    wcomb = wcomb.at[:s, :box_out].set(w_box.T)
    wcomb = wcomb.at[s:two_s, box_out:out_w].set(w_cls.T)
    bcomb = jnp.zeros((1, out_p), jnp.float32)
    bcomb = bcomb.at[0, :box_out].set(b_box.astype(jnp.float32))
    bcomb = bcomb.at[0, box_out:out_w].set(b_cls.astype(jnp.float32))

    x = features.reshape(-1, in_dim)
    n = x.shape[0]

    # --- pick the largest row tile that fits a conservative VMEM budget ------
    # Budget is set against v7x (64 MiB physical VMEM): resident weights plus
    # double-buffered input and output tiles must fit with headroom.
    itemsize = np.dtype(dtype).itemsize
    weight_bytes = (wsub_t.size * np.dtype(wsub_t.dtype).itemsize
                    + wcomb.size * np.dtype(wcomb.dtype).itemsize
                    + bsub_p.size * 4 + bcomb.size * 4)
    vmem_budget = 40 * 1024 * 1024
    tile_budget = max(vmem_budget - weight_bytes, 4 * 1024 * 1024)
    per_row_bytes = 2 * (in_dim_p * itemsize + out_p * itemsize)  # 2x = double buffer
    tm = int(tile_budget // per_row_bytes)
    tm = max(8, min(tm, 2048))
    tm = (tm // 8) * 8
    tm = min(tm, _round_up(n, 8))        # don't over-pad tiny inputs

    n_pad = _round_up(n, tm)
    x = jnp.pad(x, ((0, n_pad - n), (0, in_dim_p - in_dim)))

    grid = (n_pad // tm,)

    out = pl.pallas_call(
        _probe_kernel,
        out_shape=jax.ShapeDtypeStruct((n_pad, out_p), dtype),
        grid_spec=pltpu.PrefetchScalarGridSpec(
            num_scalar_prefetch=0,
            grid=grid,
            in_specs=[
                pl.BlockSpec((tm, in_dim_p), lambda i: (i, 0)),      # x tile (streamed)
                pl.BlockSpec((in_dim_p, two_s_p), lambda i: (0, 0)),  # sub weight (resident)
                pl.BlockSpec((1, two_s_p), lambda i: (0, 0)),         # sub bias
                pl.BlockSpec((two_s_p, out_p), lambda i: (0, 0)),     # fused head weight
                pl.BlockSpec((1, out_p), lambda i: (0, 0)),           # fused head bias
            ],
            out_specs=pl.BlockSpec((tm, out_p), lambda i: (i, 0)),
        ),
        compiler_params=pltpu.CompilerParams(
            dimension_semantics=("parallel",),
            vmem_limit_bytes=48 * 1024 * 1024),
    )(x, wsub_t, bsub_p, wcomb, bcomb)

    pred_box = out[:n, :box_out].reshape(*lead_shape, box_out)
    pred_cls = out[:n, box_out:out_w].reshape(*lead_shape, cls_out)
    return {"pred_box": pred_box, "pred_cls": pred_cls}


def init_params(key, in_dim, box_out_dim, cls_out_dim, subfeature_dim, dtype=jnp.float32):
    """Deterministic PyTorch-Linear-style init (uniform +-1/sqrt(fan_in))."""
    ks = jax.random.split(key, 6)

    def lin(kw, kb, out_f, in_f):
        bound = 1.0 / jnp.sqrt(in_f)
        w = jax.random.uniform(kw, (out_f, in_f), dtype, -bound, bound)
        b = jax.random.uniform(kb, (out_f,), dtype, -bound, bound)
        return w, b

    w_sub, b_sub = lin(ks[0], ks[1], 2 * subfeature_dim, in_dim)
    w_box, b_box = lin(ks[2], ks[3], box_out_dim, subfeature_dim)
    w_cls, b_cls = lin(ks[4], ks[5], cls_out_dim, subfeature_dim)
    return {"w_sub": w_sub, "b_sub": b_sub,
            "w_box": w_box, "b_box": b_box,
            "w_cls": w_cls, "b_cls": b_cls}


def reference(features, p):
    sub = features @ p["w_sub"].T + p["b_sub"]
    s = p["w_box"].shape[1]
    box_sf, cls_sf = sub[..., :s], sub[..., s:]
    return {"pred_box": box_sf @ p["w_box"].T + p["b_box"],
            "pred_cls": cls_sf @ p["w_cls"].T + p["b_cls"]}


if __name__ == "__main__":
    batch, seq = 2, 8
    in_dim, subfeature_dim = 32, 16
    box_out_dim, cls_out_dim = 4, 8

    key = jax.random.PRNGKey(0)
    k_feat, k_params = jax.random.split(key)

    features = jax.random.normal(k_feat, (batch, seq, in_dim), jnp.float32)
    params = init_params(k_params, in_dim, box_out_dim, cls_out_dim, subfeature_dim)

    out = feature_split_probe(features, params)
    jax.block_until_ready(out)

    ref = reference(features, params)
    assert out["pred_box"].shape == (batch, seq, box_out_dim)
    assert out["pred_cls"].shape == (batch, seq, cls_out_dim)
    assert jnp.allclose(out["pred_box"], ref["pred_box"], atol=1e-4, rtol=1e-4)
    assert jnp.allclose(out["pred_cls"], ref["pred_cls"], atol=1e-4, rtol=1e-4)

    print("KERNEL_OK")
</pallas_src>

<mosaic_0001>
module attributes {stable_mosaic.version = 11 : i64} {
  func.func @_probe_kernel(%arg0: i32, %arg1: memref<16x128xf32, #tpu.memory_space<vmem>>, %arg2: memref<128x128xf32, #tpu.memory_space<vmem>>, %arg3: memref<1x128xf32, #tpu.memory_space<vmem>>, %arg4: memref<128x128xf32, #tpu.memory_space<vmem>>, %arg5: memref<1x128xf32, #tpu.memory_space<vmem>>, %arg6: memref<16x128xf32, #tpu.memory_space<vmem>>) attributes {dimension_semantics = [#tpu.dimension_semantics<parallel>], iteration_bounds = array<i64: 1>, scalar_prefetch = 0 : i64, scratch_operands = 0 : i64, tpu.core_type = #tpu.core_type<tc>, window_params = [{transform_indices = @transform_0, window_bounds = array<i64: 16, 128>}, {pipeline_mode = #tpu.pipeline_mode<synchronous>, transform_indices = @transform_1, window_bounds = array<i64: 128, 128>}, {pipeline_mode = #tpu.pipeline_mode<synchronous>, transform_indices = @transform_2, window_bounds = array<i64: 1, 128>}, {pipeline_mode = #tpu.pipeline_mode<synchronous>, transform_indices = @transform_3, window_bounds = array<i64: 128, 128>}, {pipeline_mode = #tpu.pipeline_mode<synchronous>, transform_indices = @transform_4, window_bounds = array<i64: 1, 128>}, {transform_indices = @transform_5, window_bounds = array<i64: 16, 128>}]} {
    %c0 = arith.constant 0 : index
    %c0_0 = arith.constant 0 : index
    %0 = vector.load %arg1[%c0, %c0_0] : memref<16x128xf32, #tpu.memory_space<vmem>>, vector<16x128xf32>
    %c0_1 = arith.constant 0 : index
    %c0_2 = arith.constant 0 : index
    %1 = vector.load %arg2[%c0_1, %c0_2] : memref<128x128xf32, #tpu.memory_space<vmem>>, vector<128x128xf32>
    %cst = arith.constant dense<0.000000e+00> : vector<16x128xf32>
    %2 = tpu.matmul %0, %1, %cst {dimension_numbers = #tpu.dot_dimension_numbers<[1], [0], [0], [1], [0, 0, 1, 1], [], []>} : vector<16x128xf32>, vector<128x128xf32>, vector<16x128xf32> -> vector<16x128xf32>
    %c0_3 = arith.constant 0 : index
    %c0_4 = arith.constant 0 : index
    %3 = vector.load %arg3[%c0_3, %c0_4] : memref<1x128xf32, #tpu.memory_space<vmem>>, vector<1x128xf32>
    %4 = vector.broadcast %3 : vector<1x128xf32> to vector<16x128xf32>
    %5 = arith.addf %2, %4 : vector<16x128xf32>
    %c0_5 = arith.constant 0 : index
    %c0_6 = arith.constant 0 : index
    %6 = vector.load %arg4[%c0_5, %c0_6] : memref<128x128xf32, #tpu.memory_space<vmem>>, vector<128x128xf32>
    %cst_7 = arith.constant dense<0.000000e+00> : vector<16x128xf32>
    %7 = tpu.matmul %5, %6, %cst_7 {dimension_numbers = #tpu.dot_dimension_numbers<[1], [0], [0], [1], [0, 0, 1, 1], [], []>} : vector<16x128xf32>, vector<128x128xf32>, vector<16x128xf32> -> vector<16x128xf32>
    %c0_8 = arith.constant 0 : index
    %c0_9 = arith.constant 0 : index
    %8 = vector.load %arg5[%c0_8, %c0_9] : memref<1x128xf32, #tpu.memory_space<vmem>>, vector<1x128xf32>
    %9 = vector.broadcast %8 : vector<1x128xf32> to vector<16x128xf32>
    %10 = arith.addf %7, %9 : vector<16x128xf32>
    %c0_10 = arith.constant 0 : index
    %c0_11 = arith.constant 0 : index
    %11 = vector.load %arg6[%c0_10, %c0_11] : memref<16x128xf32, #tpu.memory_space<vmem>>, vector<16x128xf32>
    tpu.vector_store %arg6[%c0_10, %c0_11], %10 {strides = array<i32>} : memref<16x128xf32, #tpu.memory_space<vmem>>, vector<16x128xf32>,
    return
  }
  func.func @transform_0(%arg0: i32) -> (i32, i32) {
    %c0_i32 = arith.constant 0 : i32
    %c0_i32_0 = arith.constant 0 : i32
    return %arg0, %c0_i32 : i32, i32
  }
  func.func @transform_1(%arg0: i32) -> (i32, i32) {
    %c0_i32 = arith.constant 0 : i32
    %c0_i32_0 = arith.constant 0 : i32
    %c0_i32_1 = arith.constant 0 : i32
    return %c0_i32, %c0_i32_0 : i32, i32
  }
  func.func @transform_2(%arg0: i32) -> (i32, i32) {
    %c0_i32 = arith.constant 0 : i32
    %c0_i32_0 = arith.constant 0 : i32
    %c0_i32_1 = arith.constant 0 : i32
    return %c0_i32, %c0_i32_0 : i32, i32
  }
  func.func @transform_3(%arg0: i32) -> (i32, i32) {
    %c0_i32 = arith.constant 0 : i32
    %c0_i32_0 = arith.constant 0 : i32
    %c0_i32_1 = arith.constant 0 : i32
    return %c0_i32, %c0_i32_0 : i32, i32
  }
  func.func @transform_4(%arg0: i32) -> (i32, i32) {
    %c0_i32 = arith.constant 0 : i32
    %c0_i32_0 = arith.constant 0 : i32
    %c0_i32_1 = arith.constant 0 : i32
    return %c0_i32, %c0_i32_0 : i32, i32
  }
  func.func @transform_5(%arg0: i32) -> (i32, i32) {
    %c0_i32 = arith.constant 0 : i32
    %c0_i32_0 = arith.constant 0 : i32
    return %arg0, %c0_i32 : i32, i32
  }
}

</mosaic_0001>

<bundles_post_ra>
// kernel: feature_split_probe.1
= control target key start
LH: loop header
LB: loop body
LE: loop exit
PB: predicated region body
PF: predicated region fallthrough
CT: control target
= control target key end

     0   :  { %s540_s1 = inlined_call_operand.vmem [shape: f32[128,128], index: 1, kind: input, shape index: {}]   ;;  %s541_s0 = inlined_call_operand.vmem [shape: f32[16,128], index: 0, kind: input, shape index: {}]   ;;  %s542_s3 = inlined_call_operand.vmem [shape: f32[128,128], index: 3, kind: input, shape index: {}]   ;;  %s543_s2 = inlined_call_operand.vmem [shape: f32[1,128], index: 2, kind: input, shape index: {}]   ;;  %s544_s4 = inlined_call_operand.vmem [shape: f32[1,128], index: 4, kind: input, shape index: {}]   ;;  %s545_s5 = inlined_call_operand.vmem [shape: f32[16,128], index: 5, kind: output, shape index: {}]  }
   0x1   :  { %v22_v0 = vld [vmem:[%s540_s1] sm:$0xff]  ;;  %v23_v1 = vld [vmem:[%s540_s1 + $0x8] sm:$0xff]  ;;  %v24_v2 = vld [vmem:[%s540_s1 + $0x10] sm:$0xff] }
   0x2   :  { %v332_v3 = vpack.c.bf16 %v23_v1, %v22_v0  ;;  %v25_v4 = vld [vmem:[%s540_s1 + $0x18] sm:$0xff]  ;;  %v26_v6 = vld [vmem:[%s540_s1 + $0x20] sm:$0xff]  ;;  %v27_v7 = vld [vmem:[%s540_s1 + $0x28] sm:$0xff] }
   0x3   :  { %v336_v5 = vpack.c.bf16 %v25_v4, %v24_v2  ;;  %v340_v8 = vpack.c.bf16 %v27_v7, %v26_v6  ;;  %v28_v9 = vld [vmem:[%s540_s1 + $0x30] sm:$0xff]  ;;  %v29_v10 = vld [vmem:[%s540_s1 + $0x38] sm:$0xff]  ;;  %v20_v11 = vld [vmem:[%s541_s0] sm:$0xff] }
   0x4   :  { %333 = vmatprep.subr.bf16.mxu0 %v332_v3  ;;  %294 = vmatprep.mubr.f32.mxu0 %v20_v11  ;;  %v120_v12 = vld [vmem:[%s542_s3] sm:$0xff]  ;;  %v121_v13 = vld [vmem:[%s542_s3 + $0x8] sm:$0xff]  ;;  %v122_v14 = vld [vmem:[%s542_s3 + $0x10] sm:$0xff]  ;;  %v344_v20 = vpack.c.bf16 %v29_v10, %v28_v9 }
   0x5   :  { %335 = vmatpush3.bf16.msra.mxu0 %v332_v3  ;;  %v364_v15 = vpack.c.bf16 %v121_v13, %v120_v12  ;;  %v123_v16 = vld [vmem:[%s542_s3 + $0x18] sm:$0xff]  ;;  %v124_v18 = vld [vmem:[%s542_s3 + $0x20] sm:$0xff]  ;;  %v125_v19 = vld [vmem:[%s542_s3 + $0x28] sm:$0xff] }
   0x6   :  { %337 = vmatprep.subr.bf16.mxu0 %v336_v5  ;;  %v368_v17 = vpack.c.bf16 %v123_v16, %v122_v14  ;;  %v30_v21 = vld [vmem:[%s540_s1 + $0x40] sm:$0xff]  ;;  %v31_v22 = vld [vmem:[%s540_s1 + $0x48] sm:$0xff]  ;;  %v372_v23 = vpack.c.bf16 %v125_v19, %v124_v18  ;;  %v126_v24 = vld [vmem:[%s542_s3 + $0x30] sm:$0xff] }
   0x7   :  { %365 = vmatprep.subr.bf16.mxu1 %v364_v15  ;;  %v127_v25 = vld [vmem:[%s542_s3 + $0x38] sm:$0xff]  ;;  %v348_v26 = vpack.c.bf16 %v31_v22, %v30_v21  ;;  %v32_v27 = vld [vmem:[%s540_s1 + $0x50] sm:$0xff]  ;;  %v128_v30 = vld [vmem:[%s542_s3 + $0x40] sm:$0xff] }
   0x8   :  { %367 = vmatpush3.bf16.msra.mxu1 %v364_v15  ;;  %v33_v28 = vld [vmem:[%s540_s1 + $0x58] sm:$0xff]  ;;  %v376_v29 = vpack.c.bf16 %v127_v25, %v126_v24  ;;  %v129_v31 = vld [vmem:[%s542_s3 + $0x48] sm:$0xff]  ;;  %v34_v33 = vld [vmem:[%s540_s1 + $0x60] sm:$0xff] }
   0x9   :  { %339 = vmatpush3.bf16.msra.mxu0 %v336_v5  ;;  %369 = vmatprep.subr.bf16.mxu1 %v368_v17  ;;  %v352_v32 = vpack.c.bf16 %v33_v28, %v32_v27  ;;  %v35_v34 = vld [vmem:[%s540_s1 + $0x68] sm:$0xff]  ;;  %v380_v35 = vpack.c.bf16 %v129_v31, %v128_v30  ;;  %v130_v36 = vld [vmem:[%s542_s3 + $0x50] sm:$0xff]  ;;  %v131_v37 = vld [vmem:[%s542_s3 + $0x58] sm:$0xff] }
   0xa   :  { %341 = vmatprep.subr.bf16.mxu0 %v340_v8  ;;  %v356_v38 = vpack.c.bf16 %v35_v34, %v34_v33  ;;  %v36_v39 = vld [vmem:[%s540_s1 + $0x70] sm:$0xff]  ;;  %v37_v40 = vld [vmem:[%s540_s1 + $0x78] sm:$0xff]  ;;  %v384_v41 = vpack.c.bf16 %v131_v37, %v130_v36  ;;  %v132_v42 = vld [vmem:[%s542_s3 + $0x60] sm:$0xff] }
   0xb   :  { %v133_v43 = vld [vmem:[%s542_s3 + $0x68] sm:$0xff]  ;;  %v360_v44 = vpack.c.bf16 %v37_v40, %v36_v39  ;;  %v134_v47 = vld [vmem:[%s542_s3 + $0x70] sm:$0xff]  ;;  %v135_v48 = vld [vmem:[%s542_s3 + $0x78] sm:$0xff] }
   0xc   :  { %371 = vmatpush3.bf16.msra.mxu1 %v368_v17  ;;  %v388_v45 = vpack.c.bf16 %v133_v43, %v132_v42  ;;  %v21_v46 = vld [vmem:[%s541_s0 + $0x8] sm:$0xff]  ;;  %v392_v49 = vpack.c.bf16 %v135_v48, %v134_v47  ;;  %v224_v50 = vld [vmem:[%s543_s2] ss:$0 sm:$0xff] }
   0xd   :  { %343 = vmatpush3.bf16.msra.mxu0 %v340_v8  ;;  %373 = vmatprep.subr.bf16.mxu1 %v372_v23  ;;  %v225_v55 = vld [vmem:[%s544_s4] ss:$0 sm:$0xff] }
   0xe   :  { %345 = vmatprep.subr.bf16.mxu0 %v344_v20 }
  0x10   :  { %375 = vmatpush3.bf16.msra.mxu1 %v372_v23 }
  0x11   :  { %347 = vmatpush3.bf16.msra.mxu0 %v344_v20  ;;  %377 = vmatprep.subr.bf16.mxu1 %v376_v29 }
  0x12   :  { %349 = vmatprep.subr.bf16.mxu0 %v348_v26 }
  0x14   :  { %379 = vmatpush3.bf16.msra.mxu1 %v376_v29 }
  0x15   :  { %351 = vmatpush3.bf16.msra.mxu0 %v348_v26  ;;  %381 = vmatprep.subr.bf16.mxu1 %v380_v35 }
  0x16   :  { %353 = vmatprep.subr.bf16.mxu0 %v352_v32 }
  0x18   :  { %383 = vmatpush3.bf16.msra.mxu1 %v380_v35 }
  0x19   :  { %355 = vmatpush3.bf16.msra.mxu0 %v352_v32  ;;  %385 = vmatprep.subr.bf16.mxu1 %v384_v41 }
  0x1a   :  { %357 = vmatprep.subr.bf16.mxu0 %v356_v38 }
  0x1c   :  { %387 = vmatpush3.bf16.msra.mxu1 %v384_v41 }
  0x1d   :  { %359 = vmatpush3.bf16.msra.mxu0 %v356_v38  ;;  %389 = vmatprep.subr.bf16.mxu1 %v388_v45 }
  0x1e   :  { %361 = vmatprep.subr.bf16.mxu0 %v360_v44 }
  0x20   :  { %391 = vmatpush3.bf16.msra.mxu1 %v388_v45 }
  0x21   :  { %363 = vmatpush3.bf16.msra.mxu0 %v360_v44  ;;  %393 = vmatprep.subr.bf16.mxu1 %v392_v49 }
  0x24   :  { %295 = vmatmul.mubr.f32.vlgmr.msra.gmra.mrb[0].mxu0 %v21_v46  ;;  %395 = vmatpush3.bf16.msra.mxu1 %v392_v49 }
  0xf7   :  { %v296_v51 = vpop.f32.mrb[0].mxu0 }
  0xf8   :  { %v111_v52 = vpop.f32.mrb[1].mxu0  ;;  %v117_v54 = vadd.f32 %v296_v51, %v224_v50 }
  0xf9   :  { %v112_v53 = vadd.f32 %v224_v50, %v111_v52 }
  0xfb   :  { %329 = vmatprep.mubr.f32.mxu1 %v112_v53 }
  0xfc   :  { %330 = vmatmul.mubr.f32.vlgmr.msra.gmra.mrb[0].mxu1 %v117_v54 }
 0x1cf   :  { %v331_v56 = vpop.f32.mrb[0].mxu1 }
 0x1d0   :  { %v215_v57 = vadd.f32 %v331_v56, %v225_v55  ;;  %v209_v58 = vpop.f32.mrb[1].mxu1 }
 0x1d1   :  { %v210_v59 = vadd.f32 %v225_v55, %v209_v58 }
 0x1d2   :  { %219 = vst [vmem:[%s545_s5 + $0x8] sm:$0xff] %v215_v57 }
 0x1d3   :  { %218 = vst [vmem:[%s545_s5] sm:$0xff] %v210_v59 }

</bundles_post_ra>
